<compile_context>
chip_gen: v6e
topology: v6e:2x2x1
jax: 0.10.0
libtpu: 0.0.40
codegen_flags: <defaults>
</compile_context>

<pallas_src>
import jax
import jax.numpy as jnp
from jax.experimental import pallas as pl
from jax.experimental.pallas import tpu as pltpu

IN_DIM = 64
H0, H1 = 1000, 200          # logical hidden sizes (PyTorch module)
H0P, H1P = 1024, 256        # lane-dense padded hidden sizes
MAX_TB = 512                # batch-tile cap, safe on v5e/v6e/v7x VMEM


def _round_up(x, m):
    return ((x + m - 1) // m) * m


def prior_disc_kernel(x_ref, w0_ref, b0_ref, w1_ref, b1_ref, w2_ref, b2_ref,
                      o_ref):
    # layer 0: (TB,64)bf16 @ (64,1024)bf16 -> f32 acc, +bias, ReLU
    x = x_ref[...].astype(jnp.bfloat16)
    h = jnp.dot(x, w0_ref[...], preferred_element_type=jnp.float32)
    h = jnp.maximum(h + b0_ref[...], 0.0)
    # layer 1: (TB,1024)bf16 @ (1024,256)bf16 -> f32 acc, +bias, ReLU
    h = jnp.dot(h.astype(jnp.bfloat16), w1_ref[...],
                preferred_element_type=jnp.float32)
    h = jnp.maximum(h + b1_ref[...], 0.0)
    # layer 2: lane reduction (XLU/VPU) instead of an N=1 MXU matmul.
    logits = jnp.sum(h * w2_ref[...], axis=-1, keepdims=True) + b2_ref[...]
    o_ref[...] = jax.nn.sigmoid(logits)


def prior_discriminator(x, packed, *, tb=None):
    """x: (B, 64) float32. packed: tuple from pack_params()."""
    B = x.shape[0]
    if tb is None:
        tb = min(MAX_TB, _round_up(max(B, 8), 8))
    Bp = _round_up(B, tb)
    if Bp != B:
        x = jnp.pad(x, ((0, Bp - B), (0, 0)))   # tail-tile padding (zeros)

    w0, b0, w1, b1, w2, b2 = packed
    grid = (pl.cdiv(Bp, tb),)

    out = pl.pallas_call(
        prior_disc_kernel,
        out_shape=jax.ShapeDtypeStruct((Bp, 1), jnp.float32),
        grid=grid,
        in_specs=[
            pl.BlockSpec((tb, IN_DIM), lambda i: (i, 0)),     # x: batch-tiled
            pl.BlockSpec((IN_DIM, H0P), lambda i: (0, 0)),    # weights stay
            pl.BlockSpec((1, H0P), lambda i: (0, 0)),         # VMEM-resident
            pl.BlockSpec((H0P, H1P), lambda i: (0, 0)),
            pl.BlockSpec((1, H1P), lambda i: (0, 0)),
            pl.BlockSpec((1, H1P), lambda i: (0, 0)),
            pl.BlockSpec((1, 1), lambda i: (0, 0)),
        ],
        out_specs=pl.BlockSpec((tb, 1), lambda i: (i, 0)),
        compiler_params=pltpu.CompilerParams(
            dimension_semantics=("parallel",)),
    )(x, w0, b0, w1, b1, w2, b2)
    return out[:B]


def init_params(key):
    """Full-precision, unpadded params matching PyTorch nn.Linear defaults.

    Weights stored as (in, out) = transpose of nn.Linear.weight;
    Uniform(-1/sqrt(fan_in), 1/sqrt(fan_in)).
    """
    def linear(key, fan_in, fan_out):
        kw, kb = jax.random.split(key)
        bound = 1.0 / jnp.sqrt(fan_in)
        w = jax.random.uniform(kw, (fan_in, fan_out), jnp.float32,
                               minval=-bound, maxval=bound)
        b = jax.random.uniform(kb, (1, fan_out), jnp.float32,
                               minval=-bound, maxval=bound)
        return w, b

    k0, k1, k2 = jax.random.split(key, 3)
    w0, b0 = linear(k0, IN_DIM, H0)
    w1, b1 = linear(k1, H0, H1)
    w2, b2 = linear(k2, H1, 1)
    return {"w0": w0, "b0": b0, "w1": w1, "b1": b1, "w2": w2, "b2": b2}


def pack_params(p):
    """Pad hidden dims to lane-dense sizes and cast big weights to bf16."""
    w0 = jnp.pad(p["w0"], ((0, 0), (0, H0P - H0))).astype(jnp.bfloat16)
    b0 = jnp.pad(p["b0"], ((0, 0), (0, H0P - H0)))                  # f32
    w1 = jnp.pad(p["w1"], ((0, H0P - H0), (0, H1P - H1))).astype(jnp.bfloat16)
    b1 = jnp.pad(p["b1"], ((0, 0), (0, H1P - H1)))                  # f32
    w2 = jnp.pad(p["w2"].T, ((0, 0), (0, H1P - H1)))                # (1,256) f32
    b2 = p["b2"]                                                    # (1,1) f32
    return (w0, b0, w1, b1, w2, b2)


def reference(x, p):
    """Pure-f32 reference of the PyTorch forward."""
    h = jnp.maximum(x @ p["w0"] + p["b0"], 0.0)
    h = jnp.maximum(h @ p["w1"] + p["b1"], 0.0)
    return jax.nn.sigmoid(h @ p["w2"] + p["b2"])


if __name__ == "__main__":
    key = jax.random.PRNGKey(0)
    kx, kp = jax.random.split(key)

    B = 8
    x = jax.random.normal(kx, (B, IN_DIM), dtype=jnp.float32)
    params = init_params(kp)
    packed = pack_params(params)

    out = prior_discriminator(x, packed)
    out = jax.block_until_ready(out)

    ref = reference(x, params)
    assert out.shape == (B, 1), out.shape
    # bf16 weights/activations feeding the MXU -> loosened tolerance.
    assert jnp.allclose(out, ref, atol=2e-2, rtol=2e-2), (
        f"max abs err = {jnp.max(jnp.abs(out - ref))}")

    print("KERNEL_OK")
</pallas_src>

<mosaic_0001>
module attributes {stable_mosaic.version = 11 : i64} {
  func.func @prior_disc_kernel(%arg0: i32, %arg1: memref<8x64xf32, #tpu.memory_space<vmem>>, %arg2: memref<64x1024xbf16, #tpu.memory_space<vmem>>, %arg3: memref<1x1024xf32, #tpu.memory_space<vmem>>, %arg4: memref<1024x256xbf16, #tpu.memory_space<vmem>>, %arg5: memref<1x256xf32, #tpu.memory_space<vmem>>, %arg6: memref<1x256xf32, #tpu.memory_space<vmem>>, %arg7: memref<1x1xf32, #tpu.memory_space<vmem>>, %arg8: memref<8x1xf32, #tpu.memory_space<vmem>>) attributes {dimension_semantics = [#tpu.dimension_semantics<parallel>], iteration_bounds = array<i64: 1>, scalar_prefetch = 0 : i64, scratch_operands = 0 : i64, tpu.core_type = #tpu.core_type<tc>, window_params = [{transform_indices = @transform_0, window_bounds = array<i64: 8, 64>}, {pipeline_mode = #tpu.pipeline_mode<synchronous>, transform_indices = @transform_1, window_bounds = array<i64: 64, 1024>}, {pipeline_mode = #tpu.pipeline_mode<synchronous>, transform_indices = @transform_2, window_bounds = array<i64: 1, 1024>}, {pipeline_mode = #tpu.pipeline_mode<synchronous>, transform_indices = @transform_3, window_bounds = array<i64: 1024, 256>}, {pipeline_mode = #tpu.pipeline_mode<synchronous>, transform_indices = @transform_4, window_bounds = array<i64: 1, 256>}, {pipeline_mode = #tpu.pipeline_mode<synchronous>, transform_indices = @transform_5, window_bounds = array<i64: 1, 256>}, {pipeline_mode = #tpu.pipeline_mode<synchronous>, transform_indices = @transform_6, window_bounds = array<i64: 1, 1>}, {transform_indices = @transform_7, window_bounds = array<i64: 8, 1>}]} {
    %c0 = arith.constant 0 : index
    %c0_0 = arith.constant 0 : index
    %0 = vector.load %arg1[%c0, %c0_0] : memref<8x64xf32, #tpu.memory_space<vmem>>, vector<8x64xf32>
    %1 = arith.truncf %0 : vector<8x64xf32> to vector<8x64xbf16>
    %c0_1 = arith.constant 0 : index
    %c0_2 = arith.constant 0 : index
    %2 = vector.load %arg2[%c0_1, %c0_2] : memref<64x1024xbf16, #tpu.memory_space<vmem>>, vector<64x1024xbf16>
    %cst = arith.constant dense<0.000000e+00> : vector<8x1024xf32>
    %3 = tpu.matmul %1, %2, %cst {dimension_numbers = #tpu.dot_dimension_numbers<[1], [0], [0], [1], [0, 0, 1, 1], [], []>} : vector<8x64xbf16>, vector<64x1024xbf16>, vector<8x1024xf32> -> vector<8x1024xf32>
    %c0_3 = arith.constant 0 : index
    %c0_4 = arith.constant 0 : index
    %4 = vector.load %arg3[%c0_3, %c0_4] : memref<1x1024xf32, #tpu.memory_space<vmem>>, vector<1x1024xf32>
    %5 = vector.broadcast %4 : vector<1x1024xf32> to vector<8x1024xf32>
    %6 = arith.addf %3, %5 : vector<8x1024xf32>
    %cst_5 = arith.constant 0.000000e+00 : f32
    %7 = vector.broadcast %cst_5 : f32 to vector<8x1024xf32>
    %8 = arith.maximumf %6, %7 : vector<8x1024xf32>
    %9 = arith.truncf %8 : vector<8x1024xf32> to vector<8x1024xbf16>
    %c0_6 = arith.constant 0 : index
    %c0_7 = arith.constant 0 : index
    %10 = vector.load %arg4[%c0_6, %c0_7] : memref<1024x256xbf16, #tpu.memory_space<vmem>>, vector<1024x256xbf16>
    %cst_8 = arith.constant dense<0.000000e+00> : vector<8x256xf32>
    %11 = tpu.matmul %9, %10, %cst_8 {dimension_numbers = #tpu.dot_dimension_numbers<[1], [0], [0], [1], [0, 0, 1, 1], [], []>} : vector<8x1024xbf16>, vector<1024x256xbf16>, vector<8x256xf32> -> vector<8x256xf32>
    %c0_9 = arith.constant 0 : index
    %c0_10 = arith.constant 0 : index
    %12 = vector.load %arg5[%c0_9, %c0_10] : memref<1x256xf32, #tpu.memory_space<vmem>>, vector<1x256xf32>
    %13 = vector.broadcast %12 : vector<1x256xf32> to vector<8x256xf32>
    %14 = arith.addf %11, %13 : vector<8x256xf32>
    %cst_11 = arith.constant 0.000000e+00 : f32
    %15 = vector.broadcast %cst_11 : f32 to vector<8x256xf32>
    %16 = arith.maximumf %14, %15 : vector<8x256xf32>
    %c0_12 = arith.constant 0 : index
    %c0_13 = arith.constant 0 : index
    %17 = vector.load %arg6[%c0_12, %c0_13] : memref<1x256xf32, #tpu.memory_space<vmem>>, vector<1x256xf32>
    %18 = vector.broadcast %17 : vector<1x256xf32> to vector<8x256xf32>
    %19 = arith.mulf %16, %18 : vector<8x256xf32>
    %cst_14 = arith.constant dense<0.000000e+00> : vector<8xf32>
    %20 = vector.multi_reduction <add>, %19, %cst_14 [1] : vector<8x256xf32> to vector<8xf32>
    %21 = vector.shape_cast %20 : vector<8xf32> to vector<8x1xf32>
    %c0_15 = arith.constant 0 : index
    %c0_16 = arith.constant 0 : index
    %22 = vector.load %arg7[%c0_15, %c0_16] : memref<1x1xf32, #tpu.memory_space<vmem>>, vector<1x1xf32>
    %23 = vector.broadcast %22 : vector<1x1xf32> to vector<8x1xf32>
    %24 = arith.addf %21, %23 : vector<8x1xf32>
    %25 = arith.negf %24 : vector<8x1xf32>
    %26 = math.exp %25 : vector<8x1xf32>
    %cst_17 = arith.constant 1.000000e+00 : f32
    %27 = vector.broadcast %cst_17 : f32 to vector<8x1xf32>
    %28 = arith.addf %27, %26 : vector<8x1xf32>
    %29 = arith.divf %27, %28 : vector<8x1xf32>
    %c0_18 = arith.constant 0 : index
    %c0_19 = arith.constant 0 : index
    %30 = vector.load %arg8[%c0_18, %c0_19] : memref<8x1xf32, #tpu.memory_space<vmem>>, vector<8x1xf32>
    tpu.vector_store %arg8[%c0_18, %c0_19], %29 {strides = array<i32>} : memref<8x1xf32, #tpu.memory_space<vmem>>, vector<8x1xf32>,
    return
  }
  func.func @transform_0(%arg0: i32) -> (i32, i32) {
    %c0_i32 = arith.constant 0 : i32
    %c0_i32_0 = arith.constant 0 : i32
    return %arg0, %c0_i32 : i32, i32
  }
  func.func @transform_1(%arg0: i32) -> (i32, i32) {
    %c0_i32 = arith.constant 0 : i32
    %c0_i32_0 = arith.constant 0 : i32
    %c0_i32_1 = arith.constant 0 : i32
    return %c0_i32, %c0_i32_0 : i32, i32
  }
  func.func @transform_2(%arg0: i32) -> (i32, i32) {
    %c0_i32 = arith.constant 0 : i32
    %c0_i32_0 = arith.constant 0 : i32
    %c0_i32_1 = arith.constant 0 : i32
    return %c0_i32, %c0_i32_0 : i32, i32
  }
  func.func @transform_3(%arg0: i32) -> (i32, i32) {
    %c0_i32 = arith.constant 0 : i32
    %c0_i32_0 = arith.constant 0 : i32
    %c0_i32_1 = arith.constant 0 : i32
    return %c0_i32, %c0_i32_0 : i32, i32
  }
  func.func @transform_4(%arg0: i32) -> (i32, i32) {
    %c0_i32 = arith.constant 0 : i32
    %c0_i32_0 = arith.constant 0 : i32
    %c0_i32_1 = arith.constant 0 : i32
    return %c0_i32, %c0_i32_0 : i32, i32
  }
  func.func @transform_5(%arg0: i32) -> (i32, i32) {
    %c0_i32 = arith.constant 0 : i32
    %c0_i32_0 = arith.constant 0 : i32
    %c0_i32_1 = arith.constant 0 : i32
    return %c0_i32, %c0_i32_0 : i32, i32
  }
  func.func @transform_6(%arg0: i32) -> (i32, i32) {
    %c0_i32 = arith.constant 0 : i32
    %c0_i32_0 = arith.constant 0 : i32
    %c0_i32_1 = arith.constant 0 : i32
    return %c0_i32, %c0_i32_0 : i32, i32
  }
  func.func @transform_7(%arg0: i32) -> (i32, i32) {
    %c0_i32 = arith.constant 0 : i32
    %c0_i32_0 = arith.constant 0 : i32
    return %arg0, %c0_i32 : i32, i32
  }
}

</mosaic_0001>

<bundles_post_ra>
// kernel: tpu_custom_call.1
= control target key start
LH: loop header
LB: loop body
LE: loop exit
PB: predicated region body
PF: predicated region fallthrough
CT: control target
= control target key end

     0   :  { %s2060_s0 = inlined_call_operand.hbm [shape: f32[8,64], index: 0, kind: input, shape index: {}]   ;;  %s2061_s1 = inlined_call_operand.hbm [shape: bf16[64,1024], index: 1, kind: input, shape index: {}]   ;;  %s2062_s2 = inlined_call_operand.hbm [shape: f32[1,1024], index: 2, kind: input, shape index: {}]   ;;  %s2063_s3 = inlined_call_operand.hbm [shape: bf16[1024,256], index: 3, kind: input, shape index: {}]   ;;  %s2064_s4 = inlined_call_operand.vmem [shape: f32[1,256], index: 4, kind: input, shape index: {}]   ;;  %s2065_s5 = inlined_call_operand.vmem [shape: f32[1,256], index: 5, kind: input, shape index: {}]   ;;  %s2066_s6 = inlined_call_operand.<no memory space> [shape: f32[1,1], index: 6, kind: input, shape index: {}]   ;;  %s2067_s7 = inlined_call_operand.vmem [shape: f32[8,1], index: 7, kind: output, shape index: {}]  }
   0x1   :  { %v12_v0 = vstv %s2066_s6 }
   0x2   :  { %13 = vst [vmem:[#allocation2] sm:$0x1] %v12_v0 }
   0x3   :  { %14 = vsyncpa [#allocation4], 0 }
   0x4   :  { %15 = vsyncpa [#allocation6], 0 }
   0x5   :  { %16 = vsyncpa [#allocation9], 0  ;;  %s1943_s26 = smov [#allocation5]  }
   0x6   :  { %s32_s27 = sshll.u32 %s1943_s26, 4  ;;  %s33_s27 = int_to_ptr.vmem [resolvable:$true] %s32_s27 }
   0x7   :  { %s1865_s28 = scalar_lea.vmem %s33_s27, 4096  ;;  %p1870_p1 = scmp.lt.s32.totalorder %s33_s27, %s33_s27 }
   0x8   :  { %p1866_p0 = scmp.ne.s32.totalorder %s33_s27, %s1865_s28  ;;  %p1871_p2 = scmp.lt.s32.totalorder %s1865_s28, %s1865_s28 }
   0xa   :  { %p1872_p3 = por %p1871_p2, %p1870_p1 }
   0xc   :  { %p1873_p4 = pnand %p1872_p3, %p1866_p0 }
   0xe   :  { %1876 = shalt.err (!%p1873_p4)
}
   0xf   :  { %s1944_s29 = smov 512   ;;  %s1945_s30 = smov 32  }
  0x10   :  { %38 = dma.hbm_to_vmem [thread:$0]  %s2061_s1, 4096, %s33_s27, [#allocation6], %s1944_s29, %s1944_s29, %s1945_s30  }
  0x11   :  { %s1946_s6 = smov [#allocation3]   ;;  %s1947_s11 = smov [#allocation7]  }
  0x12   :  { %s23_s10 = sshll.u32 %s1946_s6, 4  ;;  %s45_s12 = sshll.u32 %s1947_s11, 4  ;;  %s24_s10 = int_to_ptr.vmem [resolvable:$true] %s23_s10  ;;  %s46_s12 = int_to_ptr.vmem [resolvable:$true] %s45_s12 }
  0x13   :  { %s1885_s13 = scalar_lea.vmem %s24_s10, 128  ;;  %p1890_p6 = scmp.lt.s32.totalorder %s24_s10, %s24_s10 }
  0x14   :  { %p1886_p5 = scmp.ne.s32.totalorder %s24_s10, %s1885_s13  ;;  %p1891_p7 = scmp.lt.s32.totalorder %s1885_s13, %s1885_s13 }
  0x16   :  { %p1892_p8 = por %p1891_p7, %p1890_p6 }
  0x18   :  { %p1893_p9 = pnand %p1892_p8, %p1886_p5 }
  0x1a   :  { %1896 = shalt.err (!%p1893_p9)
}
  0x1b   :  { %26 = dma.hbm_to_vmem [thread:$0]  %s2060_s0, 128, %s24_s10, [#allocation4]  }
  0x1c   :  { %s1905_s16 = scalar_lea.vmem %s46_s12, 128  ;;  %p1910_p11 = scmp.lt.s32.totalorder %s46_s12, %s46_s12 }
  0x1d   :  { %p1906_p10 = scmp.ne.s32.totalorder %s46_s12, %s1905_s16  ;;  %p1911_p12 = scmp.lt.s32.totalorder %s1905_s16, %s1905_s16 }
  0x1f   :  { %p1912_p13 = por %p1911_p12, %p1910_p11 }
  0x21   :  { %p1913_p0 = pnand %p1912_p13, %p1906_p10 }
  0x23   :  { %1916 = shalt.err (!%p1913_p0)
}
  0x24   :  { %48 = dma.hbm_to_vmem [thread:$0]  %s2062_s2, 128, %s46_s12, [#allocation6]  }
  0x25   :  { %s1948_s18 = smov [#allocation8]  }
  0x26   :  { %s54_s19 = sshll.u32 %s1948_s18, 4  ;;  %s55_s19 = int_to_ptr.vmem [resolvable:$true] %s54_s19 }
  0x27   :  { %s1925_s20 = scalar_lea.vmem %s55_s19, 16384  ;;  %p1930_p2 = scmp.lt.s32.totalorder %s55_s19, %s55_s19 }
  0x28   :  { %p1926_p1 = scmp.ne.s32.totalorder %s55_s19, %s1925_s20  ;;  %p1931_p3 = scmp.lt.s32.totalorder %s1925_s20, %s1925_s20 }
  0x2a   :  { %p1932_p4 = por %p1931_p3, %p1930_p2 }
  0x2c   :  { %p1933_p5 = pnand %p1932_p4, %p1926_p1 }
  0x2e   :  { %1936 = shalt.err (!%p1933_p5)
}
  0x2f   :  { %s1949_s0 = smov 128   ;;  %s1950_s21 = smov 8  }
  0x30   :  { %60 = dma.hbm_to_vmem [thread:$0]  %s2063_s3, 16384, %s55_s19, [#allocation9], %s1949_s0, %s1949_s0, %s1950_s21  }
  0x31   :  { %1937 = dma.done.wait [#allocation4], 128  }
  0x32   :  { %1938 = vsyncadd [#allocation4], 4294967168 }
  0x33   :  { %1939 = dma.done.wait [#allocation6], 4224  }
  0x34   :  { %1940 = vsyncadd [#allocation6], 4294963072 }
  0x35   :  { %1941 = dma.done.wait [#allocation9], 16384  }
  0x36   :  { %1942 = vsyncadd [#allocation9], 4294950912  ;;  %v1951_v1 = vmov 0   ;;  %v106_v2 = vld [vmem:[#allocation5 + $0xc0] sm:$0xff]  ;;  %v107_v4 = vld [vmem:[#allocation5 + $0xc8] sm:$0xff]  ;;  %vm316_vm0 = vcmask 523264  }
  0x37   :  { %352 = vmatprep.mubr.bf16.mxu0 %v1951_v1  ;;  %393 = vmatprep.mubr.bf16.mxu1 %v1951_v1  ;;  %v110_v3 = vld [vmem:[#allocation5 + $0xe0] sm:$0xff]  ;;  %v111_v6 = vld [vmem:[#allocation5 + $0xe8] sm:$0xff]  ;;  %v108_v32 = vld [vmem:[#allocation5 + $0xd0] sm:$0xff]  ;;  %vm1477_vm1 = vcmask 7168  }
  0x38   :  { %v1511_v5 = vcombine.high %v106_v2, %v110_v3  ;;  %v1510_v7 = vcombine.low %v106_v2, %v110_v3  ;;  %v98_v8 = vld [vmem:[#allocation5 + $0x80] sm:$0xff]  ;;  %v1513_v10 = vcombine.high %v107_v4, %v111_v6  ;;  %v1512_v11 = vcombine.low %v107_v4, %v111_v6  ;;  %v99_v13 = vld [vmem:[#allocation5 + $0x88] sm:$0xff]  ;;  %v112_v33 = vld [vmem:[#allocation5 + $0xf0] sm:$0xff] }
  0x39   :  { %v102_v9 = vld [vmem:[#allocation5 + $0xa0] sm:$0xff]  ;;  %v103_v14 = vld [vmem:[#allocation5 + $0xa8] sm:$0xff]  ;;  %v109_v34 = vld [vmem:[#allocation5 + $0xd8] sm:$0xff]  ;;  %v1515_v39 = vcombine.high %v108_v32, %v112_v33  ;;  %v1514_v46 = vcombine.low %v108_v32, %v112_v33 }
  0x3a   :  { %v1503_v12 = vcombine.high %v98_v8, %v102_v9  ;;  %v90_v15 = vld [vmem:[#allocation5 + $0x40] sm:$0xff]  ;;  %328 = vmatprep.subr.bf16.mxu0 %v1511_v5  ;;  %v1505_v16 = vcombine.high %v99_v13, %v103_v14  ;;  %v91_v18 = vld [vmem:[#allocation5 + $0x48] sm:$0xff]  ;;  %369 = vmatprep.subr.bf16.mxu1 %v1513_v10  ;;  %v1502_v20 = vcombine.low %v98_v8, %v102_v9  ;;  %v113_v35 = vld [vmem:[#allocation5 + $0xf8] sm:$0xff] }
  0x3b   :  { %v94_v17 = vld [vmem:[#allocation5 + $0x60] sm:$0xff]  ;;  %v95_v19 = vld [vmem:[#allocation5 + $0x68] sm:$0xff]  ;;  %329 = vmatpush1.bf16.msra.mxu0 %v1510_v7  ;;  %370 = vmatpush1.bf16.msra.mxu1 %v1512_v11  ;;  %v1504_v21 = vcombine.low %v99_v13, %v103_v14  ;;  %v80_v37 = vld [vmem:[#allocation3] sm:$0xff]  ;;  %v1517_v41 = vcombine.high %v109_v34, %v113_v35  ;;  %v1516_v47 = vcombine.low %v109_v34, %v113_v35 }
  0x3c   :  { %330 = vmatprep.subr.bf16.mxu0 %v1503_v12  ;;  %v1495_v22 = vcombine.high %v90_v15, %v94_v17  ;;  %371 = vmatprep.subr.bf16.mxu1 %v1505_v16  ;;  %v1497_v23 = vcombine.high %v91_v18, %v95_v19  ;;  %v82_v24 = vld [vmem:[#allocation5] sm:$0xff]  ;;  %v83_v26 = vld [vmem:[#allocation5 + $0x8] sm:$0xff]  ;;  %v1494_v28 = vcombine.low %v90_v15, %v94_v17  ;;  %v100_v40 = vld [vmem:[#allocation5 + $0x90] sm:$0xff] }
  0x3d   :  { %v86_v25 = vld [vmem:[#allocation5 + $0x20] sm:$0xff]  ;;  %v87_v27 = vld [vmem:[#allocation5 + $0x28] sm:$0xff]  ;;  %v1496_v29 = vcombine.low %v91_v18, %v95_v19  ;;  %v104_v42 = vld [vmem:[#allocation5 + $0xb0] sm:$0xff]  ;;  %v81_v44 = vpack.c.bf16 %v80_v37, %v80_v37 }
  0x3e   :  { %v1487_v30 = vcombine.high %v82_v24, %v86_v25  ;;  %v1489_v31 = vcombine.high %v83_v26, %v87_v27  ;;  %v1486_v36 = vcombine.low %v82_v24, %v86_v25  ;;  %v1488_v38 = vcombine.low %v83_v26, %v87_v27  ;;  %v101_v43 = vld [vmem:[#allocation5 + $0x98] sm:$0xff]  ;;  %v92_v49 = vld [vmem:[#allocation5 + $0x50] sm:$0xff] }
  0x3f   :  { %331 = vmatpush1.bf16.msra.mxu0 %v1502_v20  ;;  %372 = vmatpush1.bf16.msra.mxu1 %v1504_v21  ;;  %v105_v45 = vld [vmem:[#allocation5 + $0xb8] sm:$0xff]  ;;  %v1507_v48 = vcombine.high %v100_v40, %v104_v42  ;;  %v96_v51 = vld [vmem:[#allocation5 + $0x70] sm:$0xff]  ;;  %v1506_v54 = vcombine.low %v100_v40, %v104_v42 }
  0x40   :  { %332 = vmatprep.subr.bf16.mxu0 %v1495_v22  ;;  %373 = vmatprep.subr.bf16.mxu1 %v1497_v23  ;;  %v1509_v50 = vcombine.high %v101_v43, %v105_v45  ;;  %v93_v52 = vld [vmem:[#allocation5 + $0x58] sm:$0xff]  ;;  %v1508_v55 = vcombine.low %v101_v43, %v105_v45  ;;  %v1499_v56 = vcombine.high %v92_v49, %v96_v51  ;;  %v84_v57 = vld [vmem:[#allocation5 + $0x10] sm:$0xff] }
  0x41   :  { %v97_v53 = vld [vmem:[#allocation5 + $0x78] sm:$0xff]  ;;  %v88_v59 = vld [vmem:[#allocation5 + $0x30] sm:$0xff]  ;;  %v1498_v62 = vcombine.low %v92_v49, %v96_v51 }
  0x42   :  { %v1501_v58 = vcombine.high %v93_v52, %v97_v53  ;;  %v85_v60 = vld [vmem:[#allocation5 + $0x18] sm:$0xff]  ;;  %v1500_v63 = vcombine.low %v93_v52, %v97_v53  ;;  %v1491_v0 = vcombine.high %v84_v57, %v88_v59  ;;  %v1490_v3 = vcombine.low %v84_v57, %v88_v59  ;;  %v1669_v8 = vld [vmem:[#allocation8 + $0x64] ss:$8 sps:$4 sm:$0xff]   ;;  %v1667_v10 = vld [vmem:[#allocation8 + $0x60] ss:$8 sps:$4 sm:$0xff]  }
  0x43   :  { %333 = vmatpush1.bf16.msra.mxu0 %v1494_v28  ;;  %374 = vmatpush1.bf16.msra.mxu1 %v1496_v29  ;;  %v89_v61 = vld [vmem:[#allocation5 + $0x38] sm:$0xff]  ;;  %v1672_v9 = vld [vmem:[#allocation8 + $0x164] ss:$8 sps:$4 sm:$0xff]   ;;  %v1670_v11 = vld [vmem:[#allocation8 + $0x160] ss:$8 sps:$4 sm:$0xff]  }
  0x44   :  { %334 = vmatprep.subr.bf16.mxu0 %v1487_v30  ;;  %375 = vmatprep.subr.bf16.mxu1 %v1489_v31  ;;  %v1493_v2 = vcombine.high %v85_v60, %v89_v61  ;;  %v1492_v4 = vcombine.low %v85_v60, %v89_v61  ;;  %v1663_v5 = vld [vmem:[#allocation8 + $0x74] ss:$8 sps:$4 sm:$0xff]   ;;  %v1661_v7 = vld [vmem:[#allocation8 + $0x70] ss:$8 sps:$4 sm:$0xff]   ;;  %v1681_v16 = vld [vmem:[#allocation8 + $0x44] ss:$8 sps:$4 sm:$0xff]  }
  0x45   :  { %v1666_v6 = vld [vmem:[#allocation8 + $0x174] ss:$8 sps:$4 sm:$0xff]   ;;  %v1673_v14 = vld [vmem:[#allocation8 + $0x50] ss:$8 sps:$4 sm:$0xff]   ;;  %v1684_v17 = vld [vmem:[#allocation8 + $0x144] ss:$8 sps:$4 sm:$0xff]  }
  0x46   :  { %v1675_v12 = vld [vmem:[#allocation8 + $0x54] ss:$8 sps:$4 sm:$0xff]   ;;  %v1676_v15 = vld [vmem:[#allocation8 + $0x150] ss:$8 sps:$4 sm:$0xff]   ;;  %v1679_v18 = vld [vmem:[#allocation8 + $0x40] ss:$8 sps:$4 sm:$0xff]  }
  0x47   :  { %335 = vmatpush1.bf16.msra.mxu0 %v1486_v36  ;;  %376 = vmatpush1.bf16.msra.mxu1 %v1488_v38  ;;  %v1678_v13 = vld [vmem:[#allocation8 + $0x154] ss:$8 sps:$4 sm:$0xff]   ;;  %v1682_v19 = vld [vmem:[#allocation8 + $0x140] ss:$8 sps:$4 sm:$0xff]   ;;  %v1685_v21 = vld [vmem:[#allocation8 + $0x30] ss:$8 sps:$4 sm:$0xff]  }
  0x48   :  { %410 = vmatprep.subr.bf16.mxu0 %v1515_v39  ;;  %451 = vmatprep.subr.bf16.mxu1 %v1517_v41  ;;  %v1687_v20 = vld [vmem:[#allocation8 + $0x34] ss:$8 sps:$4 sm:$0xff]   ;;  %v1688_v23 = vld [vmem:[#allocation8 + $0x130] ss:$8 sps:$4 sm:$0xff]   ;;  %v1693_v24 = vld [vmem:[#allocation8 + $0x24] ss:$8 sps:$4 sm:$0xff]  }
  0x49   :  { %v1690_v22 = vld [vmem:[#allocation8 + $0x134] ss:$8 sps:$4 sm:$0xff]   ;;  %v1696_v25 = vld [vmem:[#allocation8 + $0x124] ss:$8 sps:$4 sm:$0xff]   ;;  %v1691_v26 = vld [vmem:[#allocation8 + $0x20] ss:$8 sps:$4 sm:$0xff]  }
  0x4a   :  { %1518 = vmatmul.mubr.msk.bf16.vlgmr.msra.gmra.mxu0 %vm316_vm0, %v81_v44  ;;  %1519 = vmatmul.mubr.msk.bf16.vlgmr.msra.gmra.mxu1 %vm316_vm0, %v81_v44  ;;  %v1694_v27 = vld [vmem:[#allocation8 + $0x120] ss:$8 sps:$4 sm:$0xff]   ;;  %v1699_v28 = vld [vmem:[#allocation8 + $0x14] ss:$8 sps:$4 sm:$0xff]   ;;  %v1697_v30 = vld [vmem:[#allocation8 + $0x10] ss:$8 sps:$4 sm:$0xff]  }
  0x4b   :  { %411 = vmatpush1.bf16.msra.mxu0 %v1514_v46  ;;  %452 = vmatpush1.bf16.msra.mxu1 %v1516_v47  ;;  %v1702_v29 = vld [vmem:[#allocation8 + $0x114] ss:$8 sps:$4 sm:$0xff]   ;;  %v1700_v31 = vld [vmem:[#allocation8 + $0x110] ss:$8 sps:$4 sm:$0xff]   ;;  %v1705_v32 = vld [vmem:[#allocation8 + $0x4] ss:$8 sps:$4 sm:$0xff]  }
  0x4c   :  { %412 = vmatprep.subr.bf16.mxu0 %v1507_v48  ;;  %453 = vmatprep.subr.bf16.mxu1 %v1509_v50  ;;  %v1708_v33 = vld [vmem:[#allocation8 + $0x104] ss:$8 sps:$4 sm:$0xff]   ;;  %v1703_v34 = vld [vmem:[#allocation8] ss:$8 sps:$4 sm:$0xff]   ;;  %v1711_v36 = vld [vmem:[#allocation8 + $0xf4] ss:$8 sps:$4 sm:$0xff]  }
  0x4d   :  { %434 = vmatprep.mubr.bf16.mxu0 %v1951_v1  ;;  %475 = vmatprep.mubr.bf16.mxu1 %v1951_v1  ;;  %v1664_v1 = vld [vmem:[#allocation8 + $0x170] ss:$8 sps:$4 sm:$0xff]   ;;  %v1706_v35 = vld [vmem:[#allocation8 + $0x100] ss:$8 sps:$4 sm:$0xff]   ;;  %v1714_v37 = vld [vmem:[#allocation8 + $0x1f4] ss:$8 sps:$4 sm:$0xff]  }
  0x4e   :  { %v1709_v38 = vld [vmem:[#allocation8 + $0xf0] ss:$8 sps:$4 sm:$0xff]   ;;  %v1717_v40 = vld [vmem:[#allocation8 + $0xe4] ss:$8 sps:$4 sm:$0xff]   ;;  %v1715_v42 = vld [vmem:[#allocation8 + $0xe0] ss:$8 sps:$4 sm:$0xff]  }
  0x4f   :  { %413 = vmatpush1.bf16.msra.mxu0 %v1506_v54  ;;  %454 = vmatpush1.bf16.msra.mxu1 %v1508_v55  ;;  %v1712_v39 = vld [vmem:[#allocation8 + $0x1f0] ss:$8 sps:$4 sm:$0xff]   ;;  %v1720_v41 = vld [vmem:[#allocation8 + $0x1e4] ss:$8 sps:$4 sm:$0xff]   ;;  %v1718_v43 = vld [vmem:[#allocation8 + $0x1e0] ss:$8 sps:$4 sm:$0xff]  }
  0x50   :  { %414 = vmatprep.subr.bf16.mxu0 %v1499_v56  ;;  %455 = vmatprep.subr.bf16.mxu1 %v1501_v58  ;;  %v1726_v45 = vld [vmem:[#allocation8 + $0x1d4] ss:$8 sps:$4 sm:$0xff]   ;;  %v1721_v46 = vld [vmem:[#allocation8 + $0xd0] ss:$8 sps:$4 sm:$0xff]   ;;  %v1729_v48 = vld [vmem:[#allocation8 + $0xc4] ss:$8 sps:$4 sm:$0xff]  }
  0x51   :  { %v1724_v47 = vld [vmem:[#allocation8 + $0x1d0] ss:$8 sps:$4 sm:$0xff]   ;;  %v1732_v49 = vld [vmem:[#allocation8 + $0x1c4] ss:$8 sps:$4 sm:$0xff]   ;;  %v1727_v50 = vld [vmem:[#allocation8 + $0xc0] ss:$8 sps:$4 sm:$0xff]  }
  0x52   :  { %v1730_v51 = vld [vmem:[#allocation8 + $0x1c0] ss:$8 sps:$4 sm:$0xff]   ;;  %v1735_v52 = vld [vmem:[#allocation8 + $0xb4] ss:$8 sps:$4 sm:$0xff]   ;;  %v1733_v54 = vld [vmem:[#allocation8 + $0xb0] ss:$8 sps:$4 sm:$0xff]  }
  0x53   :  { %415 = vmatpush1.bf16.msra.mxu0 %v1498_v62  ;;  %456 = vmatpush1.bf16.msra.mxu1 %v1500_v63  ;;  %v1738_v53 = vld [vmem:[#allocation8 + $0x1b4] ss:$8 sps:$4 sm:$0xff]   ;;  %v1736_v55 = vld [vmem:[#allocation8 + $0x1b0] ss:$8 sps:$4 sm:$0xff]   ;;  %v1741_v56 = vld [vmem:[#allocation8 + $0xa4] ss:$8 sps:$4 sm:$0xff]  }
  0x54   :  { %416 = vmatprep.subr.bf16.mxu0 %v1491_v0  ;;  %457 = vmatprep.subr.bf16.mxu1 %v1493_v2  ;;  %v1744_v57 = vld [vmem:[#allocation8 + $0x1a4] ss:$8 sps:$4 sm:$0xff]   ;;  %v1739_v58 = vld [vmem:[#allocation8 + $0xa0] ss:$8 sps:$4 sm:$0xff]   ;;  %v1747_v60 = vld [vmem:[#allocation8 + $0x94] ss:$8 sps:$4 sm:$0xff]  }
  0x55   :  { %v1742_v59 = vld [vmem:[#allocation8 + $0x1a0] ss:$8 sps:$4 sm:$0xff]   ;;  %v1750_v61 = vld [vmem:[#allocation8 + $0x194] ss:$8 sps:$4 sm:$0xff]   ;;  %v1745_v62 = vld [vmem:[#allocation8 + $0x90] ss:$8 sps:$4 sm:$0xff]  }
  0x56   :  { %v1748_v63 = vld [vmem:[#allocation8 + $0x190] ss:$8 sps:$4 sm:$0xff]   ;;  %v1753_v0 = vld [vmem:[#allocation8 + $0x84] ss:$8 sps:$4 sm:$0xff]  }
  0x57   :  { %417 = vmatpush1.bf16.msra.mxu0 %v1490_v3  ;;  %458 = vmatpush1.bf16.msra.mxu1 %v1492_v4  ;;  %v1756_v2 = vld [vmem:[#allocation8 + $0x184] ss:$8 sps:$4 sm:$0xff]   ;;  %v1751_v3 = vld [vmem:[#allocation8 + $0x80] ss:$8 sps:$4 sm:$0xff]  }
  0x58   :  { %1280 = vmatprep.subr.bf16.mxu0 %v1663_v5  ;;  %1321 = vmatprep.subr.bf16.mxu1 %v1666_v6  ;;  %v1754_v4 = vld [vmem:[#allocation8 + $0x180] ss:$8 sps:$4 sm:$0xff]   ;;  %v1759_v5 = vld [vmem:[#allocation8 + $0x274] ss:$8 sps:$4 sm:$0xff]  }
  0x59   :  { %v1762_v6 = vld [vmem:[#allocation8 + $0x374] ss:$8 sps:$4 sm:$0xff]  }
  0x5a   :  { %1520 = vmatmul.mubr.msk.bf16.vlgmr.msra.gmra.mxu0 %vm316_vm0, %v81_v44  ;;  %1521 = vmatmul.mubr.msk.bf16.vlgmr.msra.gmra.mxu1 %vm316_vm0, %v81_v44  ;;  %v1723_v44 = vld [vmem:[#allocation8 + $0xd4] ss:$8 sps:$4 sm:$0xff]  }
  0x5b   :  { %1281 = vmatpush1.bf16.msra.mxu0 %v1661_v7  ;;  %1322 = vmatpush1.bf16.msra.mxu1 %v1664_v1  ;;  %v116_v7 = vlaneseq }
  0x5c   :  { %1282 = vmatprep.subr.bf16.mxu0 %v1669_v8  ;;  %1323 = vmatprep.subr.bf16.mxu1 %v1672_v9  ;;  %v2020_v9 = vld [vmem:[#allocation7] sm:$0xff] }
  0x5d   :  { %v2015_v1 = vshrl.u32 %v116_v7, 7 }
  0x5f   :  { %1283 = vmatpush1.bf16.msra.mxu0 %v1667_v10  ;;  %1324 = vmatpush1.bf16.msra.mxu1 %v1670_v11  ;;  %v2018_v8 = vsub.s32 0, %v2015_v1  ;;  %v126_v10 = vsub.s32 2, %v2015_v1  ;;  %v2024_v11 = vsub.s32 1, %v2015_v1 }
  0x60   :  { %1284 = vmatprep.subr.bf16.mxu0 %v1675_v12  ;;  %1325 = vmatprep.subr.bf16.mxu1 %v1678_v13  ;;  %v130_v12 = vsub.s32 3, %v2015_v1 }
  0x61   :  { %v119_v13 = vrot.slane %v2020_v9, %v2018_v8 }
  0x63   :  { %1285 = vmatpush1.bf16.msra.mxu0 %v1673_v14  ;;  %1326 = vmatpush1.bf16.msra.mxu1 %v1676_v15  ;;  %v127_v14 = vrot.slane %v2020_v9, %v126_v10  ;;  %v123_v15 = vrot.slane %v2020_v9, %v2024_v11  ;;  %v1784_v10 = vld [vmem:[#allocation8 + $0x330] ss:$8 sps:$4 sm:$0xff]  }
  0x64   :  { %1286 = vmatprep.subr.bf16.mxu0 %v1681_v16  ;;  %1327 = vmatprep.subr.bf16.mxu1 %v1684_v17  ;;  %v131_v17 = vrot.slane %v2020_v9, %v130_v12  ;;  %v1789_v12 = vld [vmem:[#allocation8 + $0x224] ss:$8 sps:$4 sm:$0xff]  }
  0x67   :  { %1287 = vmatpush1.bf16.msra.mxu0 %v1679_v18  ;;  %1328 = vmatpush1.bf16.msra.mxu1 %v1682_v19 }
  0x68   :  { %1288 = vmatprep.subr.bf16.mxu0 %v1687_v20  ;;  %1329 = vmatprep.subr.bf16.mxu1 %v1690_v22 }
  0x6b   :  { %1289 = vmatpush1.bf16.msra.mxu0 %v1685_v21  ;;  %1330 = vmatpush1.bf16.msra.mxu1 %v1688_v23 }
  0x6c   :  { %1290 = vmatprep.subr.bf16.mxu0 %v1693_v24  ;;  %1331 = vmatprep.subr.bf16.mxu1 %v1696_v25 }
  0x6f   :  { %1291 = vmatpush1.bf16.msra.mxu0 %v1691_v26  ;;  %1332 = vmatpush1.bf16.msra.mxu1 %v1694_v27 }
  0x70   :  { %1292 = vmatprep.subr.bf16.mxu0 %v1699_v28  ;;  %1333 = vmatprep.subr.bf16.mxu1 %v1702_v29 }
  0x73   :  { %1293 = vmatpush1.bf16.msra.mxu0 %v1697_v30  ;;  %1334 = vmatpush1.bf16.msra.mxu1 %v1700_v31 }
  0x74   :  { %1294 = vmatprep.subr.bf16.mxu0 %v1705_v32  ;;  %1335 = vmatprep.subr.bf16.mxu1 %v1708_v33 }
  0x77   :  { %1295 = vmatpush1.bf16.msra.mxu0 %v1703_v34  ;;  %1336 = vmatpush1.bf16.msra.mxu1 %v1706_v35  ;;  %v1757_v35 = vld [vmem:[#allocation8 + $0x270] ss:$8 sps:$4 sm:$0xff]  }
  0x78   :  { %1296 = vmatprep.subr.bf16.mxu0 %v1711_v36  ;;  %1337 = vmatprep.subr.bf16.mxu1 %v1714_v37 }
  0x7b   :  { %1297 = vmatpush2.bf16.msra.mxu0 %v1709_v38  ;;  %1338 = vmatpush2.bf16.msra.mxu1 %v1712_v39  ;;  %v1760_v38 = vld [vmem:[#allocation8 + $0x370] ss:$8 sps:$4 sm:$0xff]   ;;  %v1765_v39 = vld [vmem:[#allocation8 + $0x264] ss:$8 sps:$4 sm:$0xff]  }
  0x7c   :  { %1298 = vmatprep.subr.bf16.mxu0 %v1717_v40  ;;  %1339 = vmatprep.subr.bf16.mxu1 %v1720_v41  ;;  %v1768_v40 = vld [vmem:[#allocation8 + $0x364] ss:$8 sps:$4 sm:$0xff]   ;;  %v1763_v41 = vld [vmem:[#allocation8 + $0x260] ss:$8 sps:$4 sm:$0xff]  }
  0x7f   :  { %1299 = vmatpush2.bf16.msra.mxu0 %v1715_v42  ;;  %1340 = vmatpush2.bf16.msra.mxu1 %v1718_v43  ;;  %v138_v42 = vsub.s32 5, %v2015_v1  ;;  %v1766_v43 = vld [vmem:[#allocation8 + $0x360] ss:$8 sps:$4 sm:$0xff]  }
  0x80   :  { %1300 = vmatprep.subr.bf16.mxu0 %v1723_v44  ;;  %1341 = vmatprep.subr.bf16.mxu1 %v1726_v45  ;;  %v1771_v44 = vld [vmem:[#allocation8 + $0x254] ss:$8 sps:$4 sm:$0xff]   ;;  %v146_v45 = vsub.s32 7, %v2015_v1 }
  0x83   :  { %1301 = vmatpush2.bf16.msra.mxu0 %v1721_v46  ;;  %1342 = vmatpush2.bf16.msra.mxu1 %v1724_v47  ;;  %v1774_v46 = vld [vmem:[#allocation8 + $0x354] ss:$8 sps:$4 sm:$0xff]   ;;  %v1769_v47 = vld [vmem:[#allocation8 + $0x250] ss:$8 sps:$4 sm:$0xff]  }
  0x84   :  { %1302 = vmatprep.subr.bf16.mxu0 %v1729_v48  ;;  %1343 = vmatprep.subr.bf16.mxu1 %v1732_v49  ;;  %v139_v48 = vrot.slane %v2020_v9, %v138_v42  ;;  %v1772_v49 = vld [vmem:[#allocation8 + $0x350] ss:$8 sps:$4 sm:$0xff]   ;;  %v1834_v42 = vld [vmem:[#allocation8 + $0x3b4] ss:$8 sps:$4 sm:$0xff]  }
  0x87   :  { %1303 = vmatpush2.bf16.msra.mxu0 %v1727_v50  ;;  %1344 = vmatpush2.bf16.msra.mxu1 %v1730_v51  ;;  %v1777_v50 = vld [vmem:[#allocation8 + $0x244] ss:$8 sps:$4 sm:$0xff]  }
  0x88   :  { %1304 = vmatprep.subr.bf16.mxu0 %v1735_v52  ;;  %1345 = vmatprep.subr.bf16.mxu1 %v1738_v53  ;;  %v147_v52 = vrot.slane %v2020_v9, %v146_v45  ;;  %v1780_v53 = vld [vmem:[#allocation8 + $0x344] ss:$8 sps:$4 sm:$0xff]   ;;  %v134_v45 = vsub.s32 4, %v2015_v1 }
  0x8b   :  { %1305 = vmatpush2.bf16.msra.mxu0 %v1733_v54  ;;  %1346 = vmatpush2.bf16.msra.mxu1 %v1736_v55 }
  0x8c   :  { %1306 = vmatprep.subr.bf16.mxu0 %v1741_v56  ;;  %1347 = vmatprep.subr.bf16.mxu1 %v1744_v57  ;;  %v1775_v56 = vld [vmem:[#allocation8 + $0x240] ss:$8 sps:$4 sm:$0xff]  }
  0x8f   :  { %1307 = vmatpush2.bf16.msra.mxu0 %v1739_v58  ;;  %1348 = vmatpush2.bf16.msra.mxu1 %v1742_v59  ;;  %v1778_v59 = vld [vmem:[#allocation8 + $0x340] ss:$8 sps:$4 sm:$0xff]  }
  0x90   :  { %1308 = vmatprep.subr.bf16.mxu0 %v1747_v60  ;;  %1349 = vmatprep.subr.bf16.mxu1 %v1750_v61  ;;  %v1783_v60 = vld [vmem:[#allocation8 + $0x234] ss:$8 sps:$4 sm:$0xff]  }
  0x93   :  { %1309 = vmatpush2.bf16.msra.mxu0 %v1745_v62  ;;  %1350 = vmatpush2.bf16.msra.mxu1 %v1748_v63  ;;  %v1786_v63 = vld [vmem:[#allocation8 + $0x334] ss:$8 sps:$4 sm:$0xff]  }
  0x94   :  { %1310 = vmatprep.subr.bf16.mxu0 %v1753_v0  ;;  %1351 = vmatprep.subr.bf16.mxu1 %v1756_v2 }
  0x97   :  { %1311 = vmatpush2.bf16.msra.mxu0 %v1751_v3  ;;  %1352 = vmatpush2.bf16.msra.mxu1 %v1754_v4 }
  0x98   :  { %1362 = vmatprep.subr.bf16.mxu0 %v1759_v5  ;;  %1403 = vmatprep.subr.bf16.mxu1 %v1762_v6  ;;  %v1781_v5 = vld [vmem:[#allocation8 + $0x230] ss:$8 sps:$4 sm:$0xff]  }
 0x10a   :  { %v354_v16 = vpop.f32.mrf.mxu0  ;;  %v395_v19 = vpop.f32.mrf.mxu1 }
 0x10b   :  { %v355_v18 = vadd.f32 %v354_v16, %v119_v13  ;;  %v396_v20 = vadd.f32 %v395_v19, %v127_v14  ;;  %v1792_v14 = vld [vmem:[#allocation8 + $0x324] ss:$8 sps:$4 sm:$0xff]   ;;  %v1790_v16 = vld [vmem:[#allocation8 + $0x320] ss:$8 sps:$4 sm:$0xff]   ;;  %v1793_v19 = vld [vmem:[#allocation8 + $0x210] ss:$8 sps:$4 sm:$0xff]  }
 0x10c   :  { %v356_v21 = vpop.f32.mrf.mxu0  ;;  %v397_v23 = vpop.f32.mrf.mxu1 }
 0x10d   :  { %v357_v22 = vadd.f32 %v356_v21, %v123_v15  ;;  %v484_v24 = vmax.f32 %v355_v18, 0.0  ;;  %v486_v25 = vmax.f32 %v396_v20, 0.0  ;;  %v398_v26 = vadd.f32 %v397_v23, %v131_v17  ;;  %v1787_v15 = vld [vmem:[#allocation8 + $0x220] ss:$8 sps:$4 sm:$0xff]   ;;  %v1795_v17 = vld [vmem:[#allocation8 + $0x214] ss:$8 sps:$4 sm:$0xff]  }
 0x10e   :  { %v358_v27 = vpop.f32.mrf.mxu0  ;;  %v399_v29 = vpop.f32.mrf.mxu1  ;;  %v1798_v18 = vld [vmem:[#allocation8 + $0x314] ss:$8 sps:$4 sm:$0xff]   ;;  %v1796_v20 = vld [vmem:[#allocation8 + $0x310] ss:$8 sps:$4 sm:$0xff]   ;;  %v1801_v21 = vld [vmem:[#allocation8 + $0x204] ss:$8 sps:$4 sm:$0xff]  }
 0x10f   :  { %v485_v28 = vmax.f32 %v357_v22, 0.0  ;;  %v487_v30 = vmax.f32 %v398_v26, 0.0  ;;  %v494_v32 = vpack.c.bf16 %v486_v25, %v486_v25  ;;  %v492_v36 = vpack.c.bf16 %v484_v24, %v484_v24  ;;  %v1804_v22 = vld [vmem:[#allocation8 + $0x304] ss:$8 sps:$4 sm:$0xff]   ;;  %v1799_v23 = vld [vmem:[#allocation8 + $0x200] ss:$8 sps:$4 sm:$0xff]  }
 0x110   :  { %v359_v31 = vpop.f32.mrf.mxu0  ;;  %v400_v34 = vpop.f32.mrf.mxu1  ;;  %v1802_v24 = vld [vmem:[#allocation8 + $0x300] ss:$8 sps:$4 sm:$0xff]   ;;  %v1807_v25 = vld [vmem:[#allocation8 + $0x2f4] ss:$8 sps:$4 sm:$0xff]   ;;  %v1805_v27 = vld [vmem:[#allocation8 + $0x2f0] ss:$8 sps:$4 sm:$0xff]  }
 0x111   :  { %v493_v33 = vpack.c.bf16 %v485_v28, %v485_v28  ;;  %v495_v37 = vpack.c.bf16 %v487_v30, %v487_v30  ;;  %v1810_v26 = vld [vmem:[#allocation8 + $0x3f4] ss:$8 sps:$4 sm:$0xff]   ;;  %v1808_v28 = vld [vmem:[#allocation8 + $0x3f0] ss:$8 sps:$4 sm:$0xff]   ;;  %v1813_v29 = vld [vmem:[#allocation8 + $0x2e4] ss:$8 sps:$4 sm:$0xff]  }
 0x112   :  { %v1816_v30 = vld [vmem:[#allocation8 + $0x3e4] ss:$8 sps:$4 sm:$0xff]   ;;  %v1811_v31 = vld [vmem:[#allocation8 + $0x2e0] ss:$8 sps:$4 sm:$0xff]   ;;  %v1822_v34 = vld [vmem:[#allocation8 + $0x3d4] ss:$8 sps:$4 sm:$0xff]  }
 0x113   :  { %1312 = vmatprep.mubr.bf16.mxu0 %v493_v33  ;;  %1353 = vmatprep.mubr.bf16.mxu1 %v495_v37  ;;  %v1819_v33 = vld [vmem:[#allocation8 + $0x2d4] ss:$8 sps:$4 sm:$0xff]   ;;  %v1825_v37 = vld [vmem:[#allocation8 + $0x2c4] ss:$8 sps:$4 sm:$0xff]  }
 0x114   :  { %1313 = vmatmul.mubr.bf16.vlgmr.msra.gmra.mxu0 %v492_v36  ;;  %1354 = vmatmul.mubr.bf16.vlgmr.msra.gmra.mxu1 %v494_v32  ;;  %v1814_v32 = vld [vmem:[#allocation8 + $0x3e0] ss:$8 sps:$4 sm:$0xff]   ;;  %v1820_v36 = vld [vmem:[#allocation8 + $0x3d0] ss:$8 sps:$4 sm:$0xff]  }
 0x115   :  { %1363 = vmatpush1.bf16.msra.mxu0 %v1757_v35  ;;  %1404 = vmatpush1.bf16.msra.mxu1 %v1760_v38  ;;  %v1817_v35 = vld [vmem:[#allocation8 + $0x2d0] ss:$8 sps:$4 sm:$0xff]   ;;  %v1828_v38 = vld [vmem:[#allocation8 + $0x3c4] ss:$8 sps:$4 sm:$0xff]  }
 0x116   :  { %1364 = vmatprep.subr.bf16.mxu0 %v1765_v39  ;;  %1405 = vmatprep.subr.bf16.mxu1 %v1768_v40  ;;  %v1823_v39 = vld [vmem:[#allocation8 + $0x2c0] ss:$8 sps:$4 sm:$0xff]  }
 0x117   :  { %v1826_v40 = vld [vmem:[#allocation8 + $0x3c0] ss:$8 sps:$4 sm:$0xff]  }
 0x119   :  { %1365 = vmatpush1.bf16.msra.mxu0 %v1763_v41  ;;  %1406 = vmatpush1.bf16.msra.mxu1 %v1766_v43  ;;  %v1831_v41 = vld [vmem:[#allocation8 + $0x2b4] ss:$8 sps:$4 sm:$0xff]   ;;  %v1829_v43 = vld [vmem:[#allocation8 + $0x2b0] ss:$8 sps:$4 sm:$0xff]  }
 0x11a   :  { %1366 = vmatprep.subr.bf16.mxu0 %v1771_v44  ;;  %v2036_v51 = vpop.f32.mrf.mxu0  ;;  %1407 = vmatprep.subr.bf16.mxu1 %v1774_v46  ;;  %v2039_v54 = vpop.f32.mrf.mxu1  ;;  %v142_v44 = vsub.s32 6, %v2015_v1  ;;  %v1832_v46 = vld [vmem:[#allocation8 + $0x3b0] ss:$8 sps:$4 sm:$0xff]  }
 0x11b   :  { %v1841_v1 = vld [vmem:[#allocation8 + $0x290] ss:$8 sps:$4 sm:$0xff]  }
 0x11c   :  { %v438_v55 = vpop.f32.mrf.mxu0  ;;  %v479_v58 = vpop.f32.mrf.mxu1 }
 0x11d   :  { %1367 = vmatpush1.bf16.msra.mxu0 %v1769_v47  ;;  %v439_v57 = vadd.f32 %v438_v55, %v139_v48  ;;  %1408 = vmatpush1.bf16.msra.mxu1 %v1772_v49  ;;  %v480_v62 = vadd.f32 %v479_v58, %v147_v52  ;;  %v1837_v47 = vld [vmem:[#allocation8 + $0x2a4] ss:$8 sps:$4 sm:$0xff]   ;;  %v143_v49 = vrot.slane %v2020_v9, %v142_v44  ;;  %v1843_v55 = vld [vmem:[#allocation8 + $0x294] ss:$8 sps:$4 sm:$0xff]  }
 0x11e   :  { %1368 = vmatprep.subr.bf16.mxu0 %v1777_v50  ;;  %v440_v61 = vpop.f32.mrf.mxu0  ;;  %1409 = vmatprep.subr.bf16.mxu1 %v1780_v53  ;;  %v481_v2 = vpop.f32.mrf.mxu1  ;;  %v1840_v48 = vld [vmem:[#allocation8 + $0x3a4] ss:$8 sps:$4 sm:$0xff]   ;;  %v1835_v50 = vld [vmem:[#allocation8 + $0x2a0] ss:$8 sps:$4 sm:$0xff]   ;;  %v135_v52 = vrot.slane %v2020_v9, %v134_v45 }
 0x11f   :  { %v489_v0 = vmax.f32 %v439_v57, 0.0  ;;  %v491_v3 = vmax.f32 %v480_v62, 0.0  ;;  %v1838_v53 = vld [vmem:[#allocation8 + $0x3a0] ss:$8 sps:$4 sm:$0xff]   ;;  %v478_v57 = vadd.f32 %v2039_v54, %v143_v49  ;;  %v1852_v61 = vld [vmem:[#allocation8 + $0x384] ss:$8 sps:$4 sm:$0xff]  }
 0x120   :  { %v441_v4 = vpop.f32.mrf.mxu0  ;;  %v482_v7 = vpop.f32.mrf.mxu1  ;;  %v437_v58 = vadd.f32 %v2036_v51, %v135_v52  ;;  %v1847_v9 = vld [vmem:[#allocation8 + $0x280] ss:$8 sps:$4 sm:$0xff]  }
 0x121   :  { %1369 = vmatpush1.bf16.msra.mxu0 %v1775_v56  ;;  %v497_v6 = vpack.c.bf16 %v489_v0, %v489_v0  ;;  %1410 = vmatpush1.bf16.msra.mxu1 %v1778_v59  ;;  %v499_v13 = vpack.c.bf16 %v491_v3, %v491_v3  ;;  %v1846_v56 = vld [vmem:[#allocation8 + $0x394] ss:$8 sps:$4 sm:$0xff]   ;;  %v1844_v59 = vld [vmem:[#allocation8 + $0x390] ss:$8 sps:$4 sm:$0xff]   ;;  %v490_v62 = vmax.f32 %v478_v57, 0.0 }
 0x122   :  { %1370 = vmatprep.subr.bf16.mxu0 %v1783_v60  ;;  %1411 = vmatprep.subr.bf16.mxu1 %v1786_v63  ;;  %v1849_v60 = vld [vmem:[#allocation8 + $0x284] ss:$8 sps:$4 sm:$0xff]   ;;  %v488_v63 = vmax.f32 %v437_v58, 0.0  ;;  %v1850_v0 = vld [vmem:[#allocation8 + $0x380] ss:$8 sps:$4 sm:$0xff]  }
 0x123   :  { %1394 = vmatprep.mubr.bf16.mxu0 %v497_v6  ;;  %1435 = vmatprep.mubr.bf16.mxu1 %v499_v13  ;;  %v498_v2 = vpack.c.bf16 %v490_v62, %v490_v62  ;;  %v628_v13 = vld [vmem:[%s2064_s4] sm:$0x3] }
 0x124   :  { %v496_v54 = vpack.c.bf16 %v488_v63, %v488_v63 }
 0x125   :  { %1371 = vmatpush1.bf16.msra.mxu0 %v1781_v5  ;;  %1412 = vmatpush1.bf16.msra.mxu1 %v1784_v10 }
 0x126   :  { %1372 = vmatprep.subr.bf16.mxu0 %v1789_v12  ;;  %1413 = vmatprep.subr.bf16.mxu1 %v1792_v14  ;;  %v633_v14 = vrot.slane %v628_v13, %v2018_v8 }
 0x129   :  { %1373 = vmatpush1.bf16.msra.mxu0 %v1787_v15  ;;  %1414 = vmatpush1.bf16.msra.mxu1 %v1790_v16  ;;  %v637_v15 = vrot.slane %v628_v13, %v2024_v11 }
 0x12a   :  { %1374 = vmatprep.subr.bf16.mxu0 %v1795_v17  ;;  %1415 = vmatprep.subr.bf16.mxu1 %v1798_v18 }
 0x12d   :  { %1375 = vmatpush1.bf16.msra.mxu0 %v1793_v19  ;;  %1416 = vmatpush1.bf16.msra.mxu1 %v1796_v20 }
 0x12e   :  { %1376 = vmatprep.subr.bf16.mxu0 %v1801_v21  ;;  %1417 = vmatprep.subr.bf16.mxu1 %v1804_v22 }
 0x131   :  { %1377 = vmatpush1.bf16.msra.mxu0 %v1799_v23  ;;  %1418 = vmatpush1.bf16.msra.mxu1 %v1802_v24  ;;  %v1446_v24 = vld [vmem:[%s2065_s5] sm:$0x3] }
 0x132   :  { %1378 = vmatprep.subr.bf16.mxu0 %v1807_v25  ;;  %1419 = vmatprep.subr.bf16.mxu1 %v1810_v26 }
 0x135   :  { %1379 = vmatpush2.bf16.msra.mxu0 %v1805_v27  ;;  %1420 = vmatpush2.bf16.msra.mxu1 %v1808_v28 }
 0x136   :  { %1380 = vmatprep.subr.bf16.mxu0 %v1813_v29  ;;  %1421 = vmatprep.subr.bf16.mxu1 %v1816_v30 }
 0x139   :  { %1381 = vmatpush2.bf16.msra.mxu0 %v1811_v31  ;;  %1422 = vmatpush2.bf16.msra.mxu1 %v1814_v32  ;;  %v1451_v32 = vrot.slane %v1446_v24, %v2018_v8 }
 0x13a   :  { %1382 = vmatprep.subr.bf16.mxu0 %v1819_v33  ;;  %1423 = vmatprep.subr.bf16.mxu1 %v1822_v34  ;;  %v1455_v33 = vrot.slane %v1446_v24, %v2024_v11 }
 0x13d   :  { %1383 = vmatpush2.bf16.msra.mxu0 %v1817_v35  ;;  %1424 = vmatpush2.bf16.msra.mxu1 %v1820_v36 }
 0x13e   :  { %1384 = vmatprep.subr.bf16.mxu0 %v1825_v37  ;;  %1425 = vmatprep.subr.bf16.mxu1 %v1828_v38 }
 0x141   :  { %1385 = vmatpush2.bf16.msra.mxu0 %v1823_v39  ;;  %1426 = vmatpush2.bf16.msra.mxu1 %v1826_v40  ;;  %v1650_v40 = vld [vmem:[#allocation2] ss:$0 sm:$0xff] }
 0x142   :  { %1386 = vmatprep.subr.bf16.mxu0 %v1831_v41  ;;  %1427 = vmatprep.subr.bf16.mxu1 %v1834_v42 }
 0x145   :  { %1387 = vmatpush2.bf16.msra.mxu0 %v1829_v43  ;;  %1428 = vmatpush2.bf16.msra.mxu1 %v1832_v46 }
 0x146   :  { %1388 = vmatprep.subr.bf16.mxu0 %v1837_v47  ;;  %1429 = vmatprep.subr.bf16.mxu1 %v1840_v48 }
 0x149   :  { %1389 = vmatpush2.bf16.msra.mxu0 %v1835_v50  ;;  %1430 = vmatpush2.bf16.msra.mxu1 %v1838_v53 }
 0x14a   :  { %1390 = vmatprep.subr.bf16.mxu0 %v1843_v55  ;;  %1431 = vmatprep.subr.bf16.mxu1 %v1846_v56 }
 0x14d   :  { %1391 = vmatpush2.bf16.msra.mxu0 %v1841_v1  ;;  %1432 = vmatpush2.bf16.msra.mxu1 %v1844_v59 }
 0x14e   :  { %1392 = vmatprep.subr.bf16.mxu0 %v1849_v60  ;;  %1433 = vmatprep.subr.bf16.mxu1 %v1852_v61 }
 0x151   :  { %1393 = vmatpush2.bf16.msra.mxu0 %v1847_v9  ;;  %1434 = vmatpush2.bf16.msra.mxu1 %v1850_v0 }
 0x154   :  { %1395 = vmatmul.mubr.bf16.vlgmr.msra.gmra.mxu0 %v496_v54  ;;  %1436 = vmatmul.mubr.bf16.vlgmr.msra.gmra.mxu1 %v498_v2 }
 0x1d4   :  { %v1314_v51 = vpop.f32.mrf.mxu0  ;;  %v1355_v3 = vpop.f32.mrf.mxu1 }
 0x1d5   :  { %v1315_v16 = vadd.f32 %v1314_v51, %v633_v14 }
 0x1d6   :  { %v1316_v4 = vpop.f32.mrf.mxu0  ;;  %v1357_v5 = vpop.f32.mrf.mxu1 }
 0x1d7   :  { %v1317_v17 = vadd.f32 %v1316_v4, %v637_v15  ;;  %v1356_v18 = vadd.f32 %v1355_v3, %v1315_v16 }
 0x1d8   :  { %v1318_v6 = vpop.f32.mrf.mxu0  ;;  %v1359_v7 = vpop.f32.mrf.mxu1 }
 0x1d9   :  { %v1358_v20 = vadd.f32 %v1357_v5, %v1317_v17 }
 0x1da   :  { %v1319_v10 = vpop.f32.mrf.mxu0  ;;  %v1360_v12 = vpop.f32.mrf.mxu1 }
 0x214   :  { %v1396_v19 = vpop.f32.mrf.mxu0  ;;  %v1437_v22 = vpop.f32.mrf.mxu1 }
 0x215   :  { %v1397_v21 = vadd.f32 %v1396_v19, %v1356_v18 }
 0x216   :  { %v1398_v23 = vpop.f32.mrf.mxu0  ;;  %v1439_v27 = vpop.f32.mrf.mxu1 }
 0x217   :  { %v1438_v25 = vadd.f32 %v1437_v22, %v1397_v21  ;;  %v1399_v26 = vadd.f32 %v1398_v23, %v1358_v20 }
 0x218   :  { %v1400_v28 = vpop.f32.mrf.mxu0  ;;  %v1441_v31 = vpop.f32.mrf.mxu1 }
 0x219   :  { %v1444_v29 = vmax.f32 %v1438_v25, 0.0  ;;  %v1440_v30 = vadd.f32 %v1439_v27, %v1399_v26 }
 0x21a   :  { %v1401_v34 = vpop.f32.mrf.mxu0  ;;  %v1442_v36 = vpop.f32.mrf.mxu1 }
 0x21b   :  { %v1445_v35 = vmax.f32 %v1440_v30, 0.0  ;;  %v1458_v37 = vmul.f32 %v1451_v32, %v1444_v29 }
 0x21d   :  { %v1459_v38 = vmul.f32 %v1455_v33, %v1445_v35 }
 0x21f   :  { %v1460_v39 = vadd.f32 %v1459_v38, %v1458_v37 }
 0x221   :  { %1461 = vadd.xlane.f32.xlu0 %v1460_v39 }
 0x2aa   :  { %v1462_v41 = vpop.xlane.xlu0 %1461 }
 0x2ab   :  { %v1470_v42 = vadd.f32 %v1650_v40, %v1462_v41 }
 0x2ad   :  { %v1651_v43 = vmul.f32 -1.442695, %v1470_v42 }
 0x2af   :  { %1853 = vpow2.f32 %v1651_v43 }
 0x2bc   :  { %v1854_v44 = vpop.eup %1853 }
 0x2bd   :  { %v1474_v45 = vadd.f32 1.0, %v1854_v44 }
 0x2bf   :  { %1855 = vrcp.f32 %v1474_v45 }
 0x2cc   :  { %v1856_v46 = vpop.eup %1855 }
 0x2cd   :  { %1478 = vst.msk [vmem:[%s2067_s7] sm:$0xff] %vm1477_vm1, %v1856_v46 }
 0x2ce   :  { %1483 = vsyncpa [#allocation4], 1 }
 0x2cf   :  { %1484 = vsyncpa [#allocation6], 1 }
 0x2d0   :  { %1485 = vsyncpa [#allocation9], 1 }

</bundles_post_ra>
